<compile_context>
chip_gen: v7x
topology: tpu7x:2x2x1
jax: 0.10.0
libtpu: 0.0.40
codegen_flags: <defaults>
</compile_context>

<pallas_src>
import functools

import jax
import jax.numpy as jnp
from jax.experimental import pallas as pl
from jax.experimental.pallas import tpu as pltpu


def _round_up(v, m):
    return (v + m - 1) // m * m


def _tree_max(pieces):
    """Pairwise (tree) maximum over a list of equal-shaped arrays."""
    while len(pieces) > 1:
        nxt = [jnp.maximum(pieces[i], pieces[i + 1])
               for i in range(0, len(pieces) - 1, 2)]
        if len(pieces) % 2:
            nxt.append(pieces[-1])
        pieces = nxt
    return pieces[0]


def _make_fused_kernel(layer_meta, f_out_pad, compute_dtype):
    """One block-Toeplitz matmul + per-layer max-over-time + bias + tanh."""

    def kernel(x_ref, w_ref, b_ref, o_ref):
        # x_ref: (TN, cl*d)            f32 (native dtype, cast here for MXU)
        # w_ref: (cl*d, n_cols_pad)    bf16      (all layers, block-Toeplitz)
        # b_ref: (1, f_out_pad)        f32       (concatenated biases, padded)
        # o_ref: (TN, f_out_pad)       x.dtype
        x = x_ref[...].astype(compute_dtype)   # VPU cast, hidden under DMA
        s = jnp.dot(x, w_ref[...],
                    preferred_element_type=jnp.float32)   # (TN, n_cols_pad)
        tn = s.shape[0]
        outs, used = [], 0
        for (l_out, f, col) in layer_meta:
            # Max over the conv output positions of this layer: pairwise tree
            # of static lane slices (shortens the VPU dependency chain).
            # TODO(synk): for charCNN-scale F_i (>=64) pad each layer's
            # per-timestep block to a 128-lane multiple so the max stays on
            # aligned VPU ops; irrelevant at these widths.
            pieces = [s[:, col + t * f: col + (t + 1) * f] for t in range(l_out)]
            outs.append(_tree_max(pieces))
            used += f
        if used < f_out_pad:
            outs.append(jnp.zeros((tn, f_out_pad - used), jnp.float32))
        m_all = jnp.concatenate(outs, axis=1)            # (TN, f_out_pad)
        # Bias + tanh hoisted out of the time loop (monotonicity).
        o_ref[...] = jnp.tanh(m_all + b_ref[...]).astype(o_ref.dtype)

    return kernel


def _build_toeplitz(weights, biases, kernels, cl, d, max_kernel, dtype):
    """Pack all conv layers into one (cl*d, n_cols_pad) matrix + bias row.

    Column layout: [layer0: t=0 (F0 cols), t=1, ...][layer1: ...] ...
    The symmetric char-axis padding is folded in by dropping the Toeplitz rows
    that would multiply the zero-padded positions.
    """
    l_pad = max(cl, max_kernel)
    pad_left = (l_pad - cl) // 2
    cols, layer_meta = [], []
    col = 0
    for w, k in zip(weights, kernels):
        f = int(w.shape[0])
        l_out = l_pad - k + 1
        w_kdf = jnp.transpose(w, (2, 1, 0)).astype(jnp.float32)   # (k, d, f)
        wt = jnp.zeros((l_pad, d, l_out, f), dtype=jnp.float32)
        for t in range(l_out):
            wt = wt.at[t:t + k, :, t, :].set(w_kdf)
        wt = wt[pad_left:pad_left + cl]          # drop rows hitting zero pad
        cols.append(wt.reshape(cl * d, l_out * f))
        layer_meta.append((l_out, f, col))
        col += l_out * f

    n_cols = col
    n_cols_pad = _round_up(max(n_cols, 128), 128)
    w_all = jnp.concatenate(cols, axis=1)
    if n_cols_pad > n_cols:
        w_all = jnp.pad(w_all, ((0, 0), (0, n_cols_pad - n_cols)))
    w_all = w_all.astype(dtype)

    f_total = sum(int(w.shape[0]) for w in weights)
    f_out_pad = _round_up(max(f_total, 128), 128)
    b_all = jnp.concatenate([b.reshape(-1) for b in biases]).astype(jnp.float32)
    b_all = jnp.pad(b_all, (0, f_out_pad - f_total)).reshape(1, f_out_pad)
    return w_all, b_all, layer_meta, f_total, f_out_pad


def _choose_tile(n, tile_n):
    """Largest sublane-aligned tile <= tile_n.

    Prefers an exact divisor of n (no ragged-tail pad copy) with an even grid
    of >= 2 steps (keeps both TensorCores of a 2-TC chip busy), then any
    divisor with >= 2 steps, then the largest divisor, then the raw cap.
    """
    cap = min(tile_n, n)
    cap = cap - cap % 8 if cap >= 8 else 8
    cap = max(cap, 8)
    divisors = [t for t in range(cap, 7, -8) if n % t == 0]
    for pred in (lambda t: (n // t) >= 2 and (n // t) % 2 == 0,
                 lambda t: (n // t) >= 2,
                 lambda t: True):
        for t in divisors:
            if pred(t):
                return t
    return cap


def _const_spec(shape):
    """BlockSpec for a grid-invariant operand; single-buffered when supported."""
    idx = lambda i: (0,) * len(shape)
    try:
        return pl.BlockSpec(shape, idx, pipeline_mode=pl.Buffered(1))
    except Exception:  # older JAX without pipeline_mode -> default buffering
        return pl.BlockSpec(shape, idx)


def char_cnn_forward(x, weights, biases, kernels, max_kernel, *,
                     tile_n=1024, use_bf16=True):
    """x: (b, wl, cl, d). weights[i]: (F_i, d, K_i) (PyTorch Conv1d layout)."""
    b, wl, cl, d = x.shape
    n = b * wl
    compute_dtype = jnp.bfloat16 if use_bf16 else x.dtype

    w_all, b_all, layer_meta, f_total, f_out_pad = _build_toeplitz(
        weights, biases, kernels, cl, d, max_kernel, compute_dtype)

    k_dim = cl * d
    # Flatten to (N, cl*d); NO dtype cast / pad pass here -- the bf16 cast is
    # done in-kernel so x is read from HBM exactly once at 4B/elem.
    x2 = x.reshape(n, k_dim)

    tile = _choose_tile(n, tile_n)
    n_pad = _round_up(n, tile)
    if n_pad > n:
        # Only hit when no sublane-aligned divisor of n fits under tile_n.
        x2 = jnp.pad(x2, ((0, n_pad - n), (0, 0)))
    grid = (n_pad // tile,)

    # Explicit VMEM budget: double-buffered x + out tiles, single-buffered
    # weights/bias, plus generous headroom.  Floor 32 MiB (safe on every
    # generation), cap 64 MiB (v7x physical VMEM per TensorCore).
    itemsize = jnp.dtype(x.dtype).itemsize
    vmem_needed = (2 * tile * k_dim * itemsize
                   + 2 * tile * f_out_pad * itemsize
                   + w_all.size * jnp.dtype(w_all.dtype).itemsize
                   + b_all.size * 4)
    vmem_limit = int(min(64 << 20, max(vmem_needed + (16 << 20), 32 << 20)))

    cost = pl.CostEstimate(
        flops=2 * n_pad * k_dim * int(w_all.shape[1]),
        transcendentals=n_pad * f_out_pad,
        bytes_accessed=(n_pad * k_dim * itemsize
                        + int(w_all.size) * jnp.dtype(w_all.dtype).itemsize
                        + n_pad * f_out_pad * itemsize),
    )

    out = pl.pallas_call(
        _make_fused_kernel(layer_meta, f_out_pad, compute_dtype),
        out_shape=jax.ShapeDtypeStruct((n_pad, f_out_pad), x.dtype),
        grid_spec=pltpu.PrefetchScalarGridSpec(
            num_scalar_prefetch=0,
            grid=grid,
            in_specs=[
                pl.BlockSpec((tile, k_dim), lambda i: (i, 0)),
                _const_spec(w_all.shape),
                _const_spec(b_all.shape),
            ],
            out_specs=pl.BlockSpec((tile, f_out_pad), lambda i: (i, 0)),
        ),
        compiler_params=pltpu.CompilerParams(
            dimension_semantics=("parallel",),
            vmem_limit_bytes=vmem_limit),
        cost_estimate=cost,
    )(x2, w_all, b_all)

    return out[:n, :f_total].reshape(b, wl, f_total)


def char_cnn_reference(x, weights, biases, kernels, max_kernel):
    """Pure-JAX f32 reference mirroring the PyTorch forward."""
    b, wl, cl, d = x.shape
    n = b * wl
    xr = x.reshape(n, cl, d)
    if max_kernel > cl:
        pad = max_kernel - cl
        xr = jnp.pad(xr, ((0, 0), (pad // 2, pad - pad // 2), (0, 0)))
    l_pad = xr.shape[1]
    outs = []
    for w, bvec, k in zip(weights, biases, kernels):
        l_out = l_pad - k + 1
        cols = []
        for t in range(l_out):
            win = xr[:, t:t + k, :]                       # (N, K, D)
            s = jnp.einsum('nkd,fdk->nf', win, w) + bvec  # (N, F)
            cols.append(jnp.tanh(s))
        outs.append(jnp.max(jnp.stack(cols, axis=-1), axis=-1))
    return jnp.concatenate(outs, axis=1).reshape(b, wl, -1)


if __name__ == "__main__":
    # Small shapes consistent with the module:
    #   b=2 batch, wl=8 words, cl=4 chars per word, input_size=16
    b, wl, cl, input_size = 2, 8, 4, 16
    feature_maps = [8, 16]
    kernels = [3, 5]
    max_kernel = max(kernels)   # > cl, so the symmetric-pad path is exercised

    key = jax.random.PRNGKey(0)
    kx, *kp = jax.random.split(key, 1 + 2 * len(kernels))

    x = jax.random.normal(kx, (b, wl, cl, input_size), dtype=jnp.float32)

    weights, biases = [], []
    for i, (f, k) in enumerate(zip(feature_maps, kernels)):
        weights.append(0.1 * jax.random.normal(kp[2 * i], (f, input_size, k),
                                               dtype=jnp.float32))
        biases.append(0.1 * jax.random.normal(kp[2 * i + 1], (f,),
                                              dtype=jnp.float32))

    fwd = functools.partial(char_cnn_forward, kernels=kernels,
                            max_kernel=max_kernel)
    out = fwd(x, weights, biases)
    out = jax.block_until_ready(out)

    ref = char_cnn_reference(x, weights, biases, kernels, max_kernel)
    assert out.shape == (b, wl, sum(feature_maps)), out.shape
    # bf16 matmul inputs (f32 accumulation) -> loosened tolerance vs f32 ref.
    assert jnp.allclose(out, ref, atol=2e-2, rtol=2e-2), "mismatch vs reference"

    print("KERNEL_OK")
</pallas_src>

<mosaic_0001>
module attributes {stable_mosaic.version = 11 : i64} {
  func.func @kernel(%arg0: i32, %arg1: memref<8x64xf32, #tpu.memory_space<vmem>>, %arg2: memref<64x128xbf16, #tpu.memory_space<vmem>>, %arg3: memref<1x128xf32, #tpu.memory_space<vmem>>, %arg4: memref<8x128xf32, #tpu.memory_space<vmem>>) attributes {dimension_semantics = [#tpu.dimension_semantics<parallel>], iteration_bounds = array<i64: 2>, scalar_prefetch = 0 : i64, scratch_operands = 0 : i64, tpu.core_type = #tpu.core_type<tc>, window_params = [{transform_indices = @transform_0, window_bounds = array<i64: 8, 64>}, {pipeline_mode = #tpu.pipeline_mode<synchronous>, transform_indices = @transform_1, window_bounds = array<i64: 64, 128>}, {pipeline_mode = #tpu.pipeline_mode<synchronous>, transform_indices = @transform_2, window_bounds = array<i64: 1, 128>}, {transform_indices = @transform_3, window_bounds = array<i64: 8, 128>}]} {
    %c0 = arith.constant 0 : index
    %c0_0 = arith.constant 0 : index
    %0 = vector.load %arg1[%c0, %c0_0] : memref<8x64xf32, #tpu.memory_space<vmem>>, vector<8x64xf32>
    %1 = arith.truncf %0 : vector<8x64xf32> to vector<8x64xbf16>
    %c0_1 = arith.constant 0 : index
    %c0_2 = arith.constant 0 : index
    %2 = vector.load %arg2[%c0_1, %c0_2] : memref<64x128xbf16, #tpu.memory_space<vmem>>, vector<64x128xbf16>
    %cst = arith.constant dense<0.000000e+00> : vector<8x128xf32>
    %3 = tpu.matmul %1, %2, %cst {dimension_numbers = #tpu.dot_dimension_numbers<[1], [0], [0], [1], [0, 0, 1, 1], [], []>} : vector<8x64xbf16>, vector<64x128xbf16>, vector<8x128xf32> -> vector<8x128xf32>
    %4 = vector.extract_strided_slice %3 {offsets = [0, 0], sizes = [8, 8], strides = [1, 1]} : vector<8x128xf32> to vector<8x8xf32>
    %5 = vector.extract_strided_slice %3 {offsets = [0, 8], sizes = [8, 8], strides = [1, 1]} : vector<8x128xf32> to vector<8x8xf32>
    %6 = vector.extract_strided_slice %3 {offsets = [0, 16], sizes = [8, 8], strides = [1, 1]} : vector<8x128xf32> to vector<8x8xf32>
    %7 = arith.maximumf %4, %5 : vector<8x8xf32>
    %8 = arith.maximumf %7, %6 : vector<8x8xf32>
    %9 = vector.extract_strided_slice %3 {offsets = [0, 24], sizes = [8, 16], strides = [1, 1]} : vector<8x128xf32> to vector<8x16xf32>
    %cst_3 = arith.constant 0.000000e+00 : f32
    %10 = vector.broadcast %cst_3 : f32 to vector<8x104xf32>
    %11 = tpu.concatenate %8, %9, %10 in 1 : vector<8x8xf32>, vector<8x16xf32>, vector<8x104xf32> -> vector<8x128xf32>
    %c0_4 = arith.constant 0 : index
    %c0_5 = arith.constant 0 : index
    %12 = vector.load %arg3[%c0_4, %c0_5] : memref<1x128xf32, #tpu.memory_space<vmem>>, vector<1x128xf32>
    %13 = vector.broadcast %12 : vector<1x128xf32> to vector<8x128xf32>
    %14 = arith.addf %11, %13 : vector<8x128xf32>
    %15 = math.tanh %14 : vector<8x128xf32>
    %c0_6 = arith.constant 0 : index
    %c0_7 = arith.constant 0 : index
    %16 = vector.load %arg4[%c0_6, %c0_7] : memref<8x128xf32, #tpu.memory_space<vmem>>, vector<8x128xf32>
    tpu.vector_store %arg4[%c0_6, %c0_7], %15 {strides = array<i32>} : memref<8x128xf32, #tpu.memory_space<vmem>>, vector<8x128xf32>,
    return
  }
  func.func @transform_0(%arg0: i32) -> (i32, i32) {
    %c0_i32 = arith.constant 0 : i32
    %c0_i32_0 = arith.constant 0 : i32
    return %arg0, %c0_i32 : i32, i32
  }
  func.func @transform_1(%arg0: i32) -> (i32, i32) {
    %c0_i32 = arith.constant 0 : i32
    %c0_i32_0 = arith.constant 0 : i32
    %c0_i32_1 = arith.constant 0 : i32
    return %c0_i32, %c0_i32_0 : i32, i32
  }
  func.func @transform_2(%arg0: i32) -> (i32, i32) {
    %c0_i32 = arith.constant 0 : i32
    %c0_i32_0 = arith.constant 0 : i32
    %c0_i32_1 = arith.constant 0 : i32
    return %c0_i32, %c0_i32_0 : i32, i32
  }
  func.func @transform_3(%arg0: i32) -> (i32, i32) {
    %c0_i32 = arith.constant 0 : i32
    %c0_i32_0 = arith.constant 0 : i32
    return %arg0, %c0_i32 : i32, i32
  }
}

</mosaic_0001>

<bundles_post_ra>
// kernel: tpu_custom_call.1
= control target key start
LH: loop header
LB: loop body
LE: loop exit
PB: predicated region body
PF: predicated region fallthrough
CT: control target
= control target key end

     0   :  { %8 = vsyncpa [#allocation3], 0  ;;  %s865_s0 = inlined_call_operand.hbm [shape: f32[16,64], index: 0, kind: input, shape index: {}]   ;;  %s866_s1 = inlined_call_operand.hbm [shape: bf16[64,128], index: 1, kind: input, shape index: {}]   ;;  %s867_s2 = inlined_call_operand.vmem [shape: f32[1,128], index: 2, kind: input, shape index: {}]   ;;  %s868_s3 = inlined_call_operand.hbm [shape: f32[16,128], index: 3, kind: output, shape index: {}]  }
   0x1   :  { %10 = vsyncpa [#allocation3 + $0x1], 0 }
   0x2   :  { %11 = vsyncpa [#allocation6], 0 }
   0x3   :  { %12 = vsyncpa [#allocation4], 0 }
   0x4   :  { %14 = vsyncpa [#allocation4 + $0x1], 0  ;;  %s662_s12 = smov 0   ;;  %s664_s13 = smov 0  }
   0x5   :  { %s666_s14 = smov 0   ;;  %s668_s15 = smov 0  }
   0x6 LB: > { %s683_s16 = sadd.s32 4294967295, %s631_s15   ;;  %s397_s17 = sadd.s32 4294967294, %s631_s15   ;;  %s631_s15 = sphi %s668_s15, %s888_s15   ;;  %s627_s14 = sphi %s666_s14, %s887_s14   ;;  %s623_s13 = sphi %s664_s13, %s886_s13   ;;  %s619_s12 = sphi %s662_s12, %s885_s12  }
   0x7   : > { %p40_p0 = scmp.ne.s32.totalorder %s623_s13, %s619_s12  ;;  %p869_p1 = scmp.eq.s32.totalorder %s683_s16, 0 }
   0x8   : > { %p112_p3 = scmp.eq.s32.totalorder %s397_s17, 1  ;;  %p398_p5 = scmp.ge.s32.totalorder %s631_s15, 1 }
   0x9   : > { %p692_p4 = por %p869_p1, %p40_p0  ;;  %p119_p7 = scmp.lt.s32.totalorder %s631_s15, 3 }
   0xa   : > { %p697_p6 = por %p112_p3, %p40_p0  ;;  %s633_s21 = smov [#allocation5]  }
   0xb   : > { %s872_s18 = scalar_select %p692_p4, 1, 0 }
   0xc   : > { %s873_s19 = scalar_select %p697_p6, 1, 0 }
   0xd   : > { %p702_p8 = pnand %p398_p5, %p119_p7  ;;  %s131_s22 = sshll.u32 %s633_s21, 4  ;;  %s706_s22 = int_to_ptr.vmem [resolvable:$true] %s131_s22 }
   0xe   : > { %s718_s24 = sadd.s32 1, %s631_s15   ;;  %s27_s25 = sadd.s32 1, %s627_s14 }
   0xf   : > { %s874_s20 = scalar_select %p702_p8, 1, 0 }
  0x10   : > { %p442_p9 = pneg %p702_p8  ;;  %s24_s26 = ssub.s32 %s631_s15, %s718_s24 }
  0x11   : > { %s503_s29 = scalar_lea.hbm %s866_s1, 512 }
  0x12   : > { %p713_p11 = pnand %p442_p9, %p869_p1  ;;  %p504_p12 = scmp.ne.s32.totalorder %s866_s1, %s503_s29 }
  0x13   : > { %p510_p5 = scmp.lt.u32.totalorder %s503_s29, %s866_s1 }
  0x14   : > { %p505_p13 = pneg %p713_p11 }
  0x16   : > { %p506_p0 = pnand %p505_p13, %p504_p12 }
  0x18   : > { %p507_p3 = pneg %p506_p0 }
  0x1a   : > { %p512_p7 = pnand %p510_p5, %p507_p3 }
  0x1c   : > { %515 = shalt.err (!%p512_p7)
}
  0x1d   : > { %s516_s7 = scalar_lea.vmem %s706_s22, 512  ;;  %p524_p2 = scmp.lt.s32.totalorder %s706_s22, %s706_s22 }
  0x1e   : > { %p517_p9 = scmp.ne.s32.totalorder %s706_s22, %s516_s7  ;;  %p525_p6 = scmp.lt.s32.totalorder %s516_s7, %s516_s7 }
  0x20   : > { %p519_p10 = pnand %p517_p9, %p505_p13  ;;  %p526_p4 = por %p525_p6, %p524_p2 }
  0x22   : > { %p520_p1 = pneg %p519_p10 }
  0x24   : > { %p527_p8 = pnand %p526_p4, %p520_p1 }
  0x26   : > { %530 = shalt.err (!%p527_p8)
}
  0x27   : > { %s634_s8 = smov 64   ;;  %s635_s9 = smov 4  }
  0x28   : > { %445 = dma.hbm_to_vmem [thread:$0]  (!%p713_p11), %s866_s1, 512, %s706_s22, [#allocation6], %s634_s8, %s634_s8, %s635_s9  }
  0x29   : > { %p25_p2 = scmp.eq.s32.totalorder %s24_s26, 0  ;;  %p34_p1 = scmp.ne.s32.totalorder %s627_s14, %s623_s13 }
  0x2a   : > { %p35_p4 = scmp.eq.s32.totalorder %s631_s15, 0  ;;  %p455_p6 = scmp.lt.s32.totalorder %s631_s15, 2 }
  0x2b   : > { %s749_s17 = scalar_select %p25_p2, %s627_s14, %s27_s25  }
  0x2c   : > { %p36_p8 = por %p35_p4, %p34_p1  ;;  %p876_p10 = scmp.eq.s32.totalorder %s683_s16, 1 }
  0x2d   : > { %s148_s27 = sand.u32 1, %s627_s14   ;;  %s402_s28 = sshll.u32 %s631_s15, 7 }
  0x2e   : > { %p753_p12 = por %p876_p10, %p34_p1  ;;  %s401_s29 = sshll.u32 %s148_s27, 3 }
  0x2f   : > { %s762_s4 = scalar_lea.hbm %s865_s0, %s402_s28  ;;  %s152_s22 = scalar_lea.vmem [#allocation2], %s401_s29 }
  0x30   : > { %s159_s25 = sshll.u32 %s152_s22, 4  ;;  %p764_p11 = pnand %p455_p6, %p36_p8  ;;  %s768_s25 = int_to_ptr.vmem [resolvable:$true] %s159_s25 }
  0x31   : > { %s149_s5 = scalar_lea.sflag [#allocation3], %s148_s27  ;;  %s531_s6 = scalar_lea.hbm %s762_s4, 128 }
  0x32   : > { %p532_p13 = scmp.ne.s32.totalorder %s762_s4, %s531_s6  ;;  %p533_p0 = pneg %p764_p11 }
  0x33   : > { %s536_s9 = scalar_lea.hbm %s865_s0, 256  ;;  %p537_p7 = scmp.lt.u32.totalorder %s762_s4, %s865_s0 }
  0x34   : > { %p534_p3 = pnand %p533_p0, %p532_p13  ;;  %p538_p9 = scmp.lt.u32.totalorder %s536_s9, %s531_s6 }
  0x35   : > { %p540_p1 = scmp.lt.u32.totalorder %s531_s6, %s762_s4 }
  0x36   : > { %p535_p5 = pneg %p534_p3  ;;  %p539_p2 = por %p538_p9, %p537_p7 }
  0x38   : > { %p541_p4 = por %p540_p1, %p539_p2 }
  0x3a   : > { %p542_p6 = pnand %p541_p4, %p535_p5 }
  0x3c   : > { %545 = shalt.err (!%p542_p6)
}
  0x3d   : > { %s546_s27 = scalar_lea.vmem %s768_s25, 128  ;;  %s636_s28 = smov [#allocation2]  }
  0x3e   : > { %p547_p8 = scmp.ne.s32.totalorder %s768_s25, %s546_s27  ;;  %s551_s29 = sshll.u32 %s636_s28, 4  ;;  %s552_s29 = int_to_ptr.vmem [resolvable:$false] %s551_s29 }
  0x3f   : > { %s553_s23 = scalar_lea.vmem %s552_s29, 256  ;;  %p554_p3 = scmp.lt.s32.totalorder %s768_s25, %s552_s29 }
  0x40   : > { %p549_p10 = pnand %p547_p8, %p533_p0  ;;  %p555_p7 = scmp.lt.s32.totalorder %s553_s23, %s546_s27 }
  0x42   : > { %p550_p13 = pneg %p549_p10  ;;  %p556_p9 = por %p555_p7, %p554_p3 }
  0x44   : > { %p557_p2 = pnand %p556_p9, %p550_p13 }
  0x46   : > { %560 = shalt.err (!%p557_p2)
}
  0x47   : > { %449 = dma.hbm_to_vmem [thread:$0]  (!%p764_p11), %s762_s4, 128, %s768_s25, %s149_s5  }
  0x48   : > { %p879_p5 = scmp.ne.s32.totalorder %s874_s20, 0 }
  0x49   : > { %s798_s30 = sand.u32 (!%p879_p5), 1, %s623_s13   ;;  %p880_p0 = scmp.ne.s32.totalorder (!%p879_p5), %s872_s18, 0 }
  0x4a   : > { %168 = sbr.rel (%p879_p5) target bundleno = 464 (0x1d0), region = 32  ;;  %s404_s22 = sshll.u32 (!%p879_p5), %s798_s30, 3 }
  0x4b   : > { %s171_s6 = scalar_lea.sflag (!%p879_p5), [#allocation3], %s798_s30  ;;  %s174_s7 = scalar_lea.vmem (!%p879_p5), [#allocation2], %s404_s22 }
  0x51   : > { %606 = dma.done.wait (%p880_p0), %s171_s6, 128  }
  0x52   : > { %608 = vsyncadd (%p880_p0), %s171_s6, 4294967168  ;;  %p881_p11 = scmp.eq.s32.totalorder %s683_s16, 0 }
  0x54   : > { %610 = dma.done.wait (%p881_p11), [#allocation6], 512   ;;  %p882_p1 = pmov %p881_p11 }
  0x55   : > { %v637_v0 = vmov 0.0   ;;  %vm638_vm0 = vmmov 0   ;;  %v497_v1 = vld [vmem:[#allocation5] sm:$0xff]   ;;  %v498_v2 = vld [vmem:[#allocation5 + $0x8] sm:$0xff]   ;;  %v499_v3 = vld [vmem:[#allocation5 + $0x10] sm:$0xff]   ;;  %vm236_vm1 = vcmask 523264  }
  0x56   : > { %612 = vsyncadd (%p882_p1), [#allocation6], 4294966784  ;;  %422 = vmatprep.subr.bf16.mxu0 %v637_v0  ;;  %430 = vmatprep.mubr.msk.bf16.mxu0 %vm638_vm0, %v637_v0  ;;  %v500_v4 = vld [vmem:[#allocation5 + $0x18] sm:$0xff]   ;;  %s639_s18 = smov 120   ;;  %s640_s20 = smov 112   ;;  %vm289_vm2 = vcmask 64512  }
  0x57   : > { %423 = vmatpush3.bf16.msra.mxu0 %v497_v1  ;;  %v202_v5 = vld [vmem:[%s174_s7] sm:$0xff]  ;;  %vm291_vm3 = vcmask 195584   ;;  %s414_s26 = sshll.u32 %s683_s16, 7  ;;  %s200_s5 = scalar_lea.vmem [#allocation7], %s404_s22 }
  0x58   : > { %424 = vmatprep.subr.bf16.mxu0 %v637_v0  ;;  %v203_v6 = vpack.c.bf16 %v202_v5, %v202_v5  ;;  %v412_v15 = vld [vmem:[%s867_s2] ss:$0 sm:$0xff]  ;;  %s317_s8 = sshll.u32 %s200_s5, 4  ;;  %s821_s11 = scalar_lea.hbm %s868_s3, %s414_s26  ;;  %s823_s8 = int_to_ptr.vmem [resolvable:$true] %s317_s8 }
  0x59   : > { %s304_s27 = scalar_lea.sflag [#allocation4], %s798_s30  ;;  %s561_s28 = scalar_lea.vmem %s823_s8, 128 }
  0x5a   : > { %p562_p4 = scmp.ne.s32.totalorder %s823_s8, %s561_s28  ;;  %s641_s16 = smov [#allocation7]  }
  0x5b   : > { %425 = vmatpush3.bf16.msra.mxu0 %v498_v2  ;;  %s565_s29 = sshll.u32 %s641_s16, 4  ;;  %s566_s29 = int_to_ptr.vmem [resolvable:$false] %s565_s29 }
  0x5c   : > { %426 = vmatprep.subr.bf16.mxu0 %v637_v0  ;;  %p563_p6 = pnand %p562_p4, %p753_p12  ;;  %s567_s23 = scalar_lea.vmem %s566_s29, 256 }
  0x5d   : > { %p568_p10 = scmp.lt.s32.totalorder %s823_s8, %s566_s29  ;;  %p569_p13 = scmp.lt.s32.totalorder %s567_s23, %s561_s28 }
  0x5e   : > { %p564_p8 = pneg %p563_p6 }
  0x5f   : > { %427 = vmatpush3.bf16.msra.mxu0 %v499_v3  ;;  %p570_p3 = por %p569_p13, %p568_p10 }
  0x60   : > { %428 = vmatprep.subr.bf16.mxu0 %v637_v0 }
  0x61   : > { %p571_p7 = pnand %p570_p3, %p564_p8 }
  0x63   : > { %429 = vmatpush3.bf16.msra.mxu0 %v500_v4 }
  0x66   : > { %431 = vmatmul.mubr.msk.bf16.vlgmr.msra.gmra.mrb[0].mxu0 %vm236_vm1, %v203_v6 }
 0x139   : > { %v274_v7 = vpop.f32.mrb[0].mxu0 }
 0x13a   : > { %281 = vrot.lane.b32.xlu0 %v274_v7, %s639_s18  ;;  %v432_v8 = vpop.f32.mrb[1].mxu0 }
 0x13b   : > { %v277_v9 = vpop.f32.mrb[2].mxu0 }
 0x13c   : > { %v433_v10 = vpop.f32.mrb[3].mxu0 }
 0x13e   : > { %285 = vrot.lane.b32.xlu0 %v274_v7, %s640_s20 }
 0x1ac   : > { %v282_v11 = vpop.permute.xlu0 %281 }
 0x1ad   : > { %v284_v12 = vmax.f32 %v274_v7, %v282_v11 }
 0x1b0   : > { %v286_v13 = vpop.permute.xlu0 %285 }
 0x1b1   : > { %v288_v14 = vmax.f32 %v284_v12, %v286_v13 }
 0x1b3   : > { %v290_v16 = vsel %vm289_vm2, %v288_v14, %v286_v13 }
 0x1b4   : > { %v292_v17 = vsel %vm291_vm3, %v290_v16, 0.0 }
 0x1b5   : > { %v300_v18 = vadd.f32 %v412_v15, %v292_v17 }
 0x1b7   : > { %501 = vtanh.f32 %v300_v18 }
 0x1c1   : > { %v502_v19 = vpop.eup %501 }
 0x1c2   : > { %302 = vst [vmem:[%s200_s5] sm:$0xff] %v502_v19 }
 0x1c3   : > { %574 = shalt.err (!%p571_p7)
}
 0x1c4   : > { %s575_s30 = scalar_lea.hbm %s821_s11, 128  ;;  %s579_s7 = scalar_lea.hbm %s868_s3, 256 }
 0x1c5   : > { %p576_p9 = scmp.ne.s32.totalorder %s821_s11, %s575_s30  ;;  %p580_p0 = scmp.lt.u32.totalorder %s821_s11, %s868_s3 }
 0x1c6   : > { %p581_p11 = scmp.lt.u32.totalorder %s579_s7, %s575_s30  ;;  %p583_p4 = scmp.lt.u32.totalorder %s575_s30, %s821_s11 }
 0x1c7   : > { %p577_p2 = pnand %p576_p9, %p753_p12 }
 0x1c8   : > { %p582_p1 = por %p581_p11, %p580_p0 }
 0x1c9   : > { %p578_p5 = pneg %p577_p2 }
 0x1ca   : > { %p584_p6 = por %p583_p4, %p582_p1 }
 0x1cc   : > { %p585_p8 = pnand %p584_p6, %p578_p5 }
 0x1ce   : > { %588 = shalt.err (!%p585_p8)
}
 0x1cf   : > { %440 = dma.vmem_to_hbm [thread:$0]  (%p753_p12), %s823_s8, 128, %s821_s11, %s304_s27  }
 0x1d0 PF: > { %s329_s4 = sand.u32 1, %s619_s12   ;;  %p883_p10 = scmp.ne.s32.totalorder %s873_s19, 0 }
 0x1d1   : > { %p884_p13 = scmp.ge.s32.totalorder %s631_s15, 2  ;;  %s330_s25 = scalar_lea.sflag [#allocation4], %s329_s4 }
 0x1d3   : > { %p451_p3 = pnand %p884_p13, %p883_p10 }
 0x1d5   : > { %614 = dma.done.wait (!%p451_p3), %s330_s25, 128  }
 0x1d6   : > { %616 = vsyncadd (!%p451_p3), %s330_s25, 4294967168  ;;  %p17_p7 = scmp.ge.s32.totalorder %s718_s24, 4   ;;  %s885_s12 = smov %s623_s13 }
 0x1d7   : > { %s886_s13 = smov %s627_s14  ;;  %s887_s14 = smov %s749_s17 }
 0x1d8   : > { %s888_s15 = smov %s718_s24  ;;  %19 = sbr.rel (!%p17_p7) target bundleno = 6 (0x6), region = 81 }
 0x1df   :  { %335 = vsyncpa [#allocation3], 1 }
 0x1e0   :  { %337 = vsyncpa [#allocation3 + $0x1], 1 }
 0x1e1   :  { %338 = vsyncpa [#allocation6], 1 }
 0x1e2   :  { %339 = vsyncpa [#allocation4], 1 }
 0x1e3   :  { %341 = vsyncpa [#allocation4 + $0x1], 1 }

</bundles_post_ra>
